<compile_context>
chip_gen: v5e
topology: v5e:2x2
jax: 0.10.0
libtpu: 0.0.40
codegen_flags: <defaults>
</compile_context>

<pallas_src>
import functools

import jax
import jax.numpy as jnp
from jax.experimental import pallas as pl
from jax.experimental.pallas import tpu as pltpu

_LANE = 128         # vreg lane width
_MAX_BATCH_TILE = 512


def _fused_mlp_kernel(*refs, n_layers: int):
    # refs = (x_ref, w0, b0, w1, b1, ..., w_{n-1}, b_{n-1}, o_ref)
    x_ref = refs[0]
    o_ref = refs[-1]
    wb = refs[1:-1]

    h = x_ref[...]                                   # (TB, in0), float32
    for i in range(n_layers):
        w = wb[2 * i][...]                           # (d_in, d_out), resident in VMEM
        b = wb[2 * i + 1][...]                       # (1, d_out)
        h = jnp.dot(h, w, preferred_element_type=jnp.float32) + b
        if i < n_layers - 1:
            h = jnp.tanh(h)                          # EUP slot; co-issues with MXU/VPU
    o_ref[...] = h.astype(o_ref.dtype)


def net_forward(x, params, *, batch_tile=None, pad_output_lanes=True):
    """Fused forward pass of Net: tanh after every layer except the last.

    One pallas_call for the whole MLP; intermediates stay on-chip.
    """
    x = x.astype(jnp.float32)                        # mirrors x = x.float()
    batch, in0 = x.shape
    n_layers = len(params)
    out_dim = params[-1][0].shape[1]

    # Flatten params; optionally pad the final layer to a lane-dense width so
    # the output store is unmasked (zero columns -> exact zeros, sliced away).
    flat_inputs = [x]
    in_specs = []
    dims = [in0]
    for i, (w, b) in enumerate(params):
        w = w.astype(jnp.float32)
        b = b.astype(jnp.float32)
        if pad_output_lanes and i == n_layers - 1 and (w.shape[1] % _LANE) != 0:
            pad = _LANE - (w.shape[1] % _LANE)
            w = jnp.pad(w, ((0, 0), (0, pad)))
            b = jnp.pad(b, ((0, pad),))
        flat_inputs.append(w)
        flat_inputs.append(b.reshape(1, -1))
        dims.append(w.shape[1])
    padded_out = dims[-1]

    # Batch tiling: weights resident (block (0,0) every step); rows stream.
    if batch_tile is None:
        batch_tile = batch if batch <= _MAX_BATCH_TILE else _MAX_BATCH_TILE
    tb = min(batch_tile, batch)
    grid = (pl.cdiv(batch, tb),)

    # x streams per batch tile.
    in_specs.append(pl.BlockSpec((tb, in0), lambda i: (i, 0)))
    # Each W / b is the full array at block (0, 0) -> stays resident in VMEM.
    for li in range(n_layers):
        d_in, d_out = dims[li], dims[li + 1]
        in_specs.append(pl.BlockSpec((d_in, d_out), lambda i: (0, 0)))
        in_specs.append(pl.BlockSpec((1, d_out), lambda i: (0, 0)))
    out_specs = pl.BlockSpec((tb, padded_out), lambda i: (i, 0))

    flops = 2 * batch * sum(dims[i] * dims[i + 1] for i in range(n_layers))
    transcendentals = batch * sum(dims[1:-1])        # one tanh per hidden unit
    param_bytes = sum(4 * (dims[i] * dims[i + 1] + dims[i + 1])
                      for i in range(n_layers))
    bytes_accessed = 4 * batch * (in0 + padded_out) + param_bytes

    kernel = functools.partial(_fused_mlp_kernel, n_layers=n_layers)
    y = pl.pallas_call(
        kernel,
        out_shape=jax.ShapeDtypeStruct((batch, padded_out), jnp.float32),
        grid=grid,
        in_specs=in_specs,
        out_specs=out_specs,
        compiler_params=pltpu.CompilerParams(
            # Batch rows are independent -> shard the grid across TCs (v7x).
            dimension_semantics=("parallel",),
        ),
        cost_estimate=pl.CostEstimate(
            flops=flops,
            transcendentals=transcendentals,
            bytes_accessed=bytes_accessed,
        ),
    )(*flat_inputs)

    if padded_out != out_dim:
        y = y[:, :out_dim]
    return y


def init_params(key, arch):
    """Deterministic init: one (W, b) pair per nn.Linear(arch[i-1], arch[i])."""
    params = []
    for i in range(1, len(arch)):
        in_dim, out_dim = arch[i - 1], arch[i]
        key, kw, kb = jax.random.split(key, 3)
        bound = 1.0 / jnp.sqrt(in_dim)
        # stored as (in, out): transpose of PyTorch's (out, in) weight
        w = jax.random.uniform(kw, (in_dim, out_dim), jnp.float32, -bound, bound)
        b = jax.random.uniform(kb, (out_dim,), jnp.float32, -bound, bound)
        params.append((w, b))
    return params


if __name__ == "__main__":
    key = jax.random.PRNGKey(0)
    arch = [16, 32, 32, 4]                   # arch list as passed to Net(arch, ...)
    batch = 8

    kx, kp = jax.random.split(key)
    x = jax.random.normal(kx, (batch, arch[0]), jnp.float32)
    params = init_params(kp, arch)

    out = net_forward(x, params)
    out = jax.block_until_ready(out)

    # sanity check against plain-JAX reference (same math)
    ref = x
    for i, (w, b) in enumerate(params):
        ref = ref @ w + b
        if i < len(params) - 1:
            ref = jnp.tanh(ref)
    assert out.shape == (batch, arch[-1])
    assert jnp.allclose(out, ref, atol=1e-5, rtol=1e-5)

    print("KERNEL_OK")
</pallas_src>

<mosaic_0001>
module attributes {stable_mosaic.version = 11 : i64} {
  func.func @_fused_mlp_kernel(%arg0: i32, %arg1: memref<8x16xf32, #tpu.memory_space<vmem>>, %arg2: memref<16x32xf32, #tpu.memory_space<vmem>>, %arg3: memref<1x32xf32, #tpu.memory_space<vmem>>, %arg4: memref<32x32xf32, #tpu.memory_space<vmem>>, %arg5: memref<1x32xf32, #tpu.memory_space<vmem>>, %arg6: memref<32x128xf32, #tpu.memory_space<vmem>>, %arg7: memref<1x128xf32, #tpu.memory_space<vmem>>, %arg8: memref<8x128xf32, #tpu.memory_space<vmem>>) attributes {dimension_semantics = [#tpu.dimension_semantics<parallel>], iteration_bounds = array<i64: 1>, scalar_prefetch = 0 : i64, scratch_operands = 0 : i64, tpu.core_type = #tpu.core_type<tc>, window_params = [{transform_indices = @transform_0, window_bounds = array<i64: 8, 16>}, {pipeline_mode = #tpu.pipeline_mode<synchronous>, transform_indices = @transform_1, window_bounds = array<i64: 16, 32>}, {pipeline_mode = #tpu.pipeline_mode<synchronous>, transform_indices = @transform_2, window_bounds = array<i64: 1, 32>}, {pipeline_mode = #tpu.pipeline_mode<synchronous>, transform_indices = @transform_3, window_bounds = array<i64: 32, 32>}, {pipeline_mode = #tpu.pipeline_mode<synchronous>, transform_indices = @transform_4, window_bounds = array<i64: 1, 32>}, {pipeline_mode = #tpu.pipeline_mode<synchronous>, transform_indices = @transform_5, window_bounds = array<i64: 32, 128>}, {pipeline_mode = #tpu.pipeline_mode<synchronous>, transform_indices = @transform_6, window_bounds = array<i64: 1, 128>}, {transform_indices = @transform_7, window_bounds = array<i64: 8, 128>}]} {
    %c0 = arith.constant 0 : index
    %c0_0 = arith.constant 0 : index
    %0 = vector.load %arg1[%c0, %c0_0] : memref<8x16xf32, #tpu.memory_space<vmem>>, vector<8x16xf32>
    %c0_1 = arith.constant 0 : index
    %c0_2 = arith.constant 0 : index
    %1 = vector.load %arg2[%c0_1, %c0_2] : memref<16x32xf32, #tpu.memory_space<vmem>>, vector<16x32xf32>
    %c0_3 = arith.constant 0 : index
    %c0_4 = arith.constant 0 : index
    %2 = vector.load %arg3[%c0_3, %c0_4] : memref<1x32xf32, #tpu.memory_space<vmem>>, vector<1x32xf32>
    %cst = arith.constant dense<0.000000e+00> : vector<8x32xf32>
    %3 = tpu.matmul %0, %1, %cst {dimension_numbers = #tpu.dot_dimension_numbers<[1], [0], [0], [1], [0, 0, 1, 1], [], []>} : vector<8x16xf32>, vector<16x32xf32>, vector<8x32xf32> -> vector<8x32xf32>
    %4 = vector.broadcast %2 : vector<1x32xf32> to vector<8x32xf32>
    %5 = arith.addf %3, %4 : vector<8x32xf32>
    %6 = math.tanh %5 : vector<8x32xf32>
    %c0_5 = arith.constant 0 : index
    %c0_6 = arith.constant 0 : index
    %7 = vector.load %arg4[%c0_5, %c0_6] : memref<32x32xf32, #tpu.memory_space<vmem>>, vector<32x32xf32>
    %c0_7 = arith.constant 0 : index
    %c0_8 = arith.constant 0 : index
    %8 = vector.load %arg5[%c0_7, %c0_8] : memref<1x32xf32, #tpu.memory_space<vmem>>, vector<1x32xf32>
    %cst_9 = arith.constant dense<0.000000e+00> : vector<8x32xf32>
    %9 = tpu.matmul %6, %7, %cst_9 {dimension_numbers = #tpu.dot_dimension_numbers<[1], [0], [0], [1], [0, 0, 1, 1], [], []>} : vector<8x32xf32>, vector<32x32xf32>, vector<8x32xf32> -> vector<8x32xf32>
    %10 = vector.broadcast %8 : vector<1x32xf32> to vector<8x32xf32>
    %11 = arith.addf %9, %10 : vector<8x32xf32>
    %12 = math.tanh %11 : vector<8x32xf32>
    %c0_10 = arith.constant 0 : index
    %c0_11 = arith.constant 0 : index
    %13 = vector.load %arg6[%c0_10, %c0_11] : memref<32x128xf32, #tpu.memory_space<vmem>>, vector<32x128xf32>
    %c0_12 = arith.constant 0 : index
    %c0_13 = arith.constant 0 : index
    %14 = vector.load %arg7[%c0_12, %c0_13] : memref<1x128xf32, #tpu.memory_space<vmem>>, vector<1x128xf32>
    %cst_14 = arith.constant dense<0.000000e+00> : vector<8x128xf32>
    %15 = tpu.matmul %12, %13, %cst_14 {dimension_numbers = #tpu.dot_dimension_numbers<[1], [0], [0], [1], [0, 0, 1, 1], [], []>} : vector<8x32xf32>, vector<32x128xf32>, vector<8x128xf32> -> vector<8x128xf32>
    %16 = vector.broadcast %14 : vector<1x128xf32> to vector<8x128xf32>
    %17 = arith.addf %15, %16 : vector<8x128xf32>
    %c0_15 = arith.constant 0 : index
    %c0_16 = arith.constant 0 : index
    %18 = vector.load %arg8[%c0_15, %c0_16] : memref<8x128xf32, #tpu.memory_space<vmem>>, vector<8x128xf32>
    tpu.vector_store %arg8[%c0_15, %c0_16], %17 {strides = array<i32>} : memref<8x128xf32, #tpu.memory_space<vmem>>, vector<8x128xf32>,
    return
  }
  func.func @transform_0(%arg0: i32) -> (i32, i32) {
    %c0_i32 = arith.constant 0 : i32
    %c0_i32_0 = arith.constant 0 : i32
    return %arg0, %c0_i32 : i32, i32
  }
  func.func @transform_1(%arg0: i32) -> (i32, i32) {
    %c0_i32 = arith.constant 0 : i32
    %c0_i32_0 = arith.constant 0 : i32
    %c0_i32_1 = arith.constant 0 : i32
    return %c0_i32, %c0_i32_0 : i32, i32
  }
  func.func @transform_2(%arg0: i32) -> (i32, i32) {
    %c0_i32 = arith.constant 0 : i32
    %c0_i32_0 = arith.constant 0 : i32
    %c0_i32_1 = arith.constant 0 : i32
    return %c0_i32, %c0_i32_0 : i32, i32
  }
  func.func @transform_3(%arg0: i32) -> (i32, i32) {
    %c0_i32 = arith.constant 0 : i32
    %c0_i32_0 = arith.constant 0 : i32
    %c0_i32_1 = arith.constant 0 : i32
    return %c0_i32, %c0_i32_0 : i32, i32
  }
  func.func @transform_4(%arg0: i32) -> (i32, i32) {
    %c0_i32 = arith.constant 0 : i32
    %c0_i32_0 = arith.constant 0 : i32
    %c0_i32_1 = arith.constant 0 : i32
    return %c0_i32, %c0_i32_0 : i32, i32
  }
  func.func @transform_5(%arg0: i32) -> (i32, i32) {
    %c0_i32 = arith.constant 0 : i32
    %c0_i32_0 = arith.constant 0 : i32
    %c0_i32_1 = arith.constant 0 : i32
    return %c0_i32, %c0_i32_0 : i32, i32
  }
  func.func @transform_6(%arg0: i32) -> (i32, i32) {
    %c0_i32 = arith.constant 0 : i32
    %c0_i32_0 = arith.constant 0 : i32
    %c0_i32_1 = arith.constant 0 : i32
    return %c0_i32, %c0_i32_0 : i32, i32
  }
  func.func @transform_7(%arg0: i32) -> (i32, i32) {
    %c0_i32 = arith.constant 0 : i32
    %c0_i32_0 = arith.constant 0 : i32
    return %arg0, %c0_i32 : i32, i32
  }
}

</mosaic_0001>

<bundles_post_ra>
// kernel: tpu_custom_call.1
= control target key start
LH: loop header
LB: loop body
LE: loop exit
PB: predicated region body
PF: predicated region fallthrough
CT: control target
= control target key end

     0   :  { %12 = vsyncpa [#allocation3], 0  ;;  %s422_s0 = inlined_call_operand.hbm [shape: f32[8,16], index: 0, kind: input, shape index: {}]   ;;  %s423_s1 = inlined_call_operand.hbm [shape: f32[16,32], index: 1, kind: input, shape index: {}]   ;;  %s424_s2 = inlined_call_operand.vmem [shape: f32[1,32], index: 2, kind: input, shape index: {}]   ;;  %s425_s3 = inlined_call_operand.hbm [shape: f32[32,32], index: 3, kind: input, shape index: {}]   ;;  %s426_s4 = inlined_call_operand.vmem [shape: f32[1,32], index: 4, kind: input, shape index: {}]   ;;  %s427_s5 = inlined_call_operand.hbm [shape: f32[32,128], index: 5, kind: input, shape index: {}]   ;;  %s428_s6 = inlined_call_operand.vmem [shape: f32[1,128], index: 6, kind: input, shape index: {}]   ;;  %s429_s7 = inlined_call_operand.hbm [shape: f32[8,128], index: 7, kind: output, shape index: {}]  }
   0x1   :  { %13 = vsyncpa [#allocation6], 0 }
   0x2   :  { %14 = vsyncpa [#allocation9], 0  ;;  %s31_s26 = sshll.u32 %s423_s1, 4  ;;  %s32_s26 = int_to_ptr.hbm [resolvable:$true] %s31_s26 }
   0x3   :  { %15 = vsyncpa [#allocation4], 0  ;;  %s349_s27 = smov [#allocation5]   ;;  %s21_s8 = sshll.u32 %s422_s0, 4  ;;  %s22_s8 = int_to_ptr.hbm [resolvable:$true] %s21_s8 }
   0x4   :  { %s33_s28 = sshll.u32 %s349_s27, 4  ;;  %s350_s9 = smov 128   ;;  %s34_s28 = int_to_ptr.vmem [resolvable:$true] %s33_s28 }
   0x5   :  { %s351_s10 = smov 8   ;;  %s352_s11 = smov [#allocation2]  }
   0x6   :  { %39 = dma.hbm_to_vmem [thread:$0]  %s32_s26, 256, %s34_s28, [#allocation6], %s350_s9, %s350_s9, %s351_s10  }
   0x7   :  { %s23_s12 = sshll.u32 %s352_s11, 4  ;;  %s46_s15 = sshll.u32 %s425_s3, 4  ;;  %s24_s12 = int_to_ptr.vmem [resolvable:$true] %s23_s12  ;;  %s47_s15 = int_to_ptr.hbm [resolvable:$true] %s46_s15 }
   0x8   :  { %26 = dma.hbm_to_vmem [thread:$0]  %s22_s8, 128, %s24_s12, [#allocation3]  }
   0x9   :  { %s61_s17 = sshll.u32 %s427_s5, 4  ;;  %s353_s18 = smov [#allocation7]   ;;  %s62_s17 = int_to_ptr.hbm [resolvable:$true] %s61_s17 }
   0xa   :  { %s48_s19 = sshll.u32 %s353_s18, 4  ;;  %s354_s0 = smov [#allocation8]   ;;  %s49_s19 = int_to_ptr.vmem [resolvable:$true] %s48_s19 }
   0xb   :  { %54 = dma.hbm_to_vmem [thread:$0]  %s47_s15, 512, %s49_s19, [#allocation6], %s350_s9, %s350_s9, %s351_s10  }
   0xc   :  { %s63_s20 = sshll.u32 %s354_s0, 4  ;;  %s64_s20 = int_to_ptr.vmem [resolvable:$true] %s63_s20 }
   0xd   :  { %69 = dma.hbm_to_vmem [thread:$0]  %s62_s17, 512, %s64_s20, [#allocation9], %s350_s9, %s350_s9, %s351_s10  }
   0xe   :  { %341 = dma.done.wait [#allocation3], 128  }
   0xf   :  { %342 = vsyncadd [#allocation3], 4294967168 }
  0x10   :  { %343 = dma.done.wait [#allocation6], 768  }
  0x11   :  { %344 = vsyncadd [#allocation6], 4294966528 }
  0x12   :  { %345 = dma.done.wait [#allocation9], 512  }
  0x13   :  { %346 = vsyncadd [#allocation9], 4294966784  ;;  %v90_v0 = vld [vmem:[#allocation5 + $0x8] sm:$0xff]  ;;  %v89_v1 = vld [vmem:[#allocation5] sm:$0xff]  ;;  %vm95_vm0 = vcmask 130048   ;;  %vm128_vm1 = vcmask 261120  }
  0x14   :  { %113 = vmatpush.msra.mxu0 %v90_v0  ;;  %v88_v2 = vld [vmem:[#allocation2] sm:$0xff]  ;;  %v123_v3 = vld [vmem:[#allocation7 + $0x18] sm:$0xff]  ;;  %v122_v4 = vld [vmem:[#allocation7 + $0x10] sm:$0xff]  ;;  %s355_s24 = smov [#allocation10]   ;;  %s192_s28 = sshll.u32 %s429_s7, 4  ;;  %s193_s28 = int_to_ptr.hbm [resolvable:$true] %s192_s28 }
  0x15   :  { %144 = vmatpush.msra.mxu1 %v123_v3  ;;  %v121_v5 = vld [vmem:[#allocation7 + $0x8] sm:$0xff]  ;;  %v120_v6 = vld [vmem:[#allocation7] sm:$0xff]  ;;  %v156_v11 = vld [vmem:[#allocation8 + $0x18] sm:$0xff]  ;;  %s190_s25 = sshll.u32 %s355_s24, 4  ;;  %s191_s25 = int_to_ptr.vmem [resolvable:$true] %s190_s25 }
  0x16   :  { %114 = vmatpush.msra.mxu0 %v89_v1  ;;  %v214_v7 = vld [vmem:[%s424_s2] ss:$0 sm:$0xff]  ;;  %176 = vmatpush.msra.mxu2 %v156_v11  ;;  %v155_v12 = vld [vmem:[#allocation8 + $0x10] sm:$0xff]  ;;  %v153_v14 = vld [vmem:[#allocation8] sm:$0xff] }
  0x17   :  { %204 = vmatmul.msk.f32.vlgmr.msra.gmra.mxu0 %vm95_vm0, %v88_v2  ;;  %145 = vmatpush.msra.mxu1 %v122_v4  ;;  %v154_v13 = vld [vmem:[#allocation8 + $0x8] sm:$0xff] }
  0x18   :  { %177 = vmatpush.msra.mxu2 %v155_v12  ;;  %v215_v15 = vld [vmem:[%s426_s4] ss:$0 sm:$0xff] }
  0x19   :  { %146 = vmatpush.msra.mxu1 %v121_v5  ;;  %v216_v19 = vld [vmem:[%s428_s6] ss:$0 sm:$0xff] }
  0x1a   :  { %178 = vmatpush.msra.mxu2 %v154_v13 }
  0x1b   :  { %147 = vmatpush.msra.mxu1 %v120_v6 }
  0x1c   :  { %179 = vmatpush.msra.mxu2 %v153_v14 }
  0x94   :  { %v116_v8 = vpop.f32.mrf.mxu0 }
  0x95   :  { %v117_v9 = vadd.f32 %v214_v7, %v116_v8 }
  0x97   :  { %217 = vtanh.f32 %v117_v9 }
  0x9d   :  { %v218_v10 = vpop.eup %217 }
  0x9e   :  { %205 = vmatmul.msk.f32.vlgmr.msra.gmra.mxu1 %vm128_vm1, %v218_v10 }
 0x11b   :  { %v149_v16 = vpop.f32.mrf.mxu1 }
 0x11c   :  { %v150_v17 = vadd.f32 %v215_v15, %v149_v16 }
 0x11e   :  { %219 = vtanh.f32 %v150_v17 }
 0x124   :  { %v220_v18 = vpop.eup %219 }
 0x125   :  { %206 = vmatmul.msk.f32.vlgmr.msra.gmra.mxu2 %vm128_vm1, %v220_v18 }
 0x1a8   :  { %v181_v20 = vpop.f32.mrf.mxu2 }
 0x1a9   :  { %v182_v21 = vadd.f32 %v216_v19, %v181_v20 }
 0x1ab   :  { %184 = vst [vmem:[#allocation10] sm:$0xff] %v182_v21 }
 0x1ac   :  { %195 = dma.vmem_to_hbm [thread:$0]  %s191_s25, 128, %s193_s28, [#allocation4]  }
 0x1ad   :  { %347 = dma.done.wait [#allocation4], 128  }
 0x1ae   :  { %348 = vsyncadd [#allocation4], 4294967168 }
 0x1af   :  { %200 = vsyncpa [#allocation3], 1 }
 0x1b0   :  { %201 = vsyncpa [#allocation6], 1 }
 0x1b1   :  { %202 = vsyncpa [#allocation9], 1 }
 0x1b2   :  { %203 = vsyncpa [#allocation4], 1 }

</bundles_post_ra>
